<compile_context>
chip_gen: v7x
topology: tpu7x:2x2x1
jax: 0.10.0
libtpu: 0.0.40
codegen_flags: <defaults>
</compile_context>

<pallas_src>
import jax
import jax.numpy as jnp
from jax import lax
from jax.experimental import pallas as pl
from jax.experimental.pallas import tpu as pltpu

_EPS = 1e-5


def bn_relu_kernel(x_ref, gamma_ref, beta_ref, o_ref):
    # x_ref: (N, block_c, HW) f32; gamma/beta: (1, block_c, 1) f32
    x = x_ref[...]
    m = jnp.float32(x.shape[0] * x.shape[2])

    # Single-pass per-channel statistics (training-mode, biased variance).
    s = jnp.sum(x, axis=(0, 2), keepdims=True)        # (1, block_c, 1)
    ss = jnp.sum(x * x, axis=(0, 2), keepdims=True)   # (1, block_c, 1)
    mean = s / m
    var = jnp.maximum(ss / m - mean * mean, jnp.float32(0.0))  # clamp cancellation

    # Fold normalization + affine into per-channel scale/shift.
    scale = gamma_ref[...] * lax.rsqrt(var + jnp.float32(_EPS))
    shift = beta_ref[...] - mean * scale

    # Normalize + affine + ReLU in one elementwise pass.
    o_ref[...] = jnp.maximum(x * scale + shift, jnp.float32(0.0))


def batchnorm_relu(x_nchw, gamma, beta, block_c=128):
    """x_nchw: (N, C, H, W) f32; gamma/beta: (C,) f32. Returns (N, C, H, W) f32."""
    N, C, H, W = x_nchw.shape
    HW = H * W

    # Free metadata reshape (no HBM transpose): channels stay the 2nd axis.
    x3 = x_nchw.reshape(N, C, HW).astype(jnp.float32)
    g = gamma.reshape(1, C, 1).astype(jnp.float32)
    b = beta.reshape(1, C, 1).astype(jnp.float32)

    if C % block_c != 0:
        block_c = C  # fall back to a single channel block
    grid = (C // block_c,)

    out3 = pl.pallas_call(
        bn_relu_kernel,
        out_shape=jax.ShapeDtypeStruct((N, C, HW), jnp.float32),
        grid_spec=pltpu.PrefetchScalarGridSpec(
            num_scalar_prefetch=0,
            grid=grid,
            in_specs=[
                pl.BlockSpec((N, block_c, HW), lambda i: (0, i, 0)),
                pl.BlockSpec((1, block_c, 1), lambda i: (0, i, 0)),
                pl.BlockSpec((1, block_c, 1), lambda i: (0, i, 0)),
            ],
            out_specs=pl.BlockSpec((N, block_c, HW), lambda i: (0, i, 0)),
        ),
        compiler_params=pltpu.CompilerParams(
            dimension_semantics=("parallel",),
        ),
    )(x3, g, b)

    return out3.reshape(N, C, H, W)


if __name__ == "__main__":
    key = jax.random.PRNGKey(0)
    kx, kg, kb = jax.random.split(key, 3)

    # Shapes from the module: x291 = randn([1, 512, 14, 14]), BatchNorm2d(512)
    N, C, H, W = 1, 512, 14, 14
    x = jax.random.normal(kx, (N, C, H, W), dtype=jnp.float32)
    # PyTorch default init is weight=1, bias=0; use non-trivial deterministic
    # values to exercise the affine path.
    gamma = 1.0 + 0.1 * jax.random.normal(kg, (C,), dtype=jnp.float32)
    beta = 0.1 * jax.random.normal(kb, (C,), dtype=jnp.float32)

    out = batchnorm_relu(x, gamma, beta)
    out = jax.block_until_ready(out)

    # Pure-JAX reference (training-mode BatchNorm: biased batch stats) + ReLU
    mean = jnp.mean(x, axis=(0, 2, 3), keepdims=True)
    var = jnp.mean((x - mean) ** 2, axis=(0, 2, 3), keepdims=True)
    ref = (x - mean) * lax.rsqrt(var + _EPS)
    ref = ref * gamma.reshape(1, C, 1, 1) + beta.reshape(1, C, 1, 1)
    ref = jnp.maximum(ref, 0.0)

    assert out.shape == (N, C, H, W)
    assert jnp.max(jnp.abs(out - ref)) < 2e-4

    print("KERNEL_OK")
</pallas_src>

<mosaic_0001>
module attributes {stable_mosaic.version = 11 : i64} {
  func.func @bn_relu_kernel(%arg0: i32, %arg1: memref<1x128x196xf32, #tpu.memory_space<vmem>>, %arg2: memref<1x128x1xf32, #tpu.memory_space<vmem>>, %arg3: memref<1x128x1xf32, #tpu.memory_space<vmem>>, %arg4: memref<1x128x196xf32, #tpu.memory_space<vmem>>) attributes {dimension_semantics = [#tpu.dimension_semantics<parallel>], iteration_bounds = array<i64: 4>, scalar_prefetch = 0 : i64, scratch_operands = 0 : i64, tpu.core_type = #tpu.core_type<tc>, window_params = [{transform_indices = @transform_0, window_bounds = array<i64: 1, 128, 196>}, {transform_indices = @transform_1, window_bounds = array<i64: 1, 128, 1>}, {transform_indices = @transform_2, window_bounds = array<i64: 1, 128, 1>}, {transform_indices = @transform_3, window_bounds = array<i64: 1, 128, 196>}]} {
    %c0 = arith.constant 0 : index
    %c0_0 = arith.constant 0 : index
    %c0_1 = arith.constant 0 : index
    %0 = vector.load %arg1[%c0, %c0_0, %c0_1] : memref<1x128x196xf32, #tpu.memory_space<vmem>>, vector<1x128x196xf32>
    %cst = arith.constant dense<0.000000e+00> : vector<128xf32>
    %1 = vector.multi_reduction <add>, %0, %cst [0, 2] : vector<1x128x196xf32> to vector<128xf32>
    %2 = vector.shape_cast %1 : vector<128xf32> to vector<1x128x1xf32>
    %3 = arith.mulf %0, %0 : vector<1x128x196xf32>
    %cst_2 = arith.constant dense<0.000000e+00> : vector<128xf32>
    %4 = vector.multi_reduction <add>, %3, %cst_2 [0, 2] : vector<1x128x196xf32> to vector<128xf32>
    %5 = vector.shape_cast %4 : vector<128xf32> to vector<1x128x1xf32>
    %cst_3 = arith.constant 1.960000e+02 : f32
    %6 = vector.broadcast %cst_3 : f32 to vector<1x128x1xf32>
    %7 = arith.divf %2, %6 : vector<1x128x1xf32>
    %cst_4 = arith.constant 1.960000e+02 : f32
    %8 = vector.broadcast %cst_4 : f32 to vector<1x128x1xf32>
    %9 = arith.divf %5, %8 : vector<1x128x1xf32>
    %10 = arith.mulf %7, %7 : vector<1x128x1xf32>
    %11 = arith.subf %9, %10 : vector<1x128x1xf32>
    %cst_5 = arith.constant 0.000000e+00 : f32
    %12 = vector.broadcast %cst_5 : f32 to vector<1x128x1xf32>
    %13 = arith.maximumf %11, %12 : vector<1x128x1xf32>
    %c0_6 = arith.constant 0 : index
    %c0_7 = arith.constant 0 : index
    %c0_8 = arith.constant 0 : index
    %14 = vector.load %arg2[%c0_6, %c0_7, %c0_8] : memref<1x128x1xf32, #tpu.memory_space<vmem>>, vector<1x128x1xf32>
    %cst_9 = arith.constant 9.99999974E-6 : f32
    %15 = vector.broadcast %cst_9 : f32 to vector<1x128x1xf32>
    %16 = arith.addf %13, %15 : vector<1x128x1xf32>
    %17 = math.rsqrt %16 : vector<1x128x1xf32>
    %18 = arith.mulf %14, %17 : vector<1x128x1xf32>
    %c0_10 = arith.constant 0 : index
    %c0_11 = arith.constant 0 : index
    %c0_12 = arith.constant 0 : index
    %19 = vector.load %arg3[%c0_10, %c0_11, %c0_12] : memref<1x128x1xf32, #tpu.memory_space<vmem>>, vector<1x128x1xf32>
    %20 = arith.mulf %7, %18 : vector<1x128x1xf32>
    %21 = arith.subf %19, %20 : vector<1x128x1xf32>
    %22 = vector.broadcast %18 : vector<1x128x1xf32> to vector<1x128x196xf32>
    %23 = arith.mulf %0, %22 : vector<1x128x196xf32>
    %24 = vector.broadcast %21 : vector<1x128x1xf32> to vector<1x128x196xf32>
    %25 = arith.addf %23, %24 : vector<1x128x196xf32>
    %cst_13 = arith.constant 0.000000e+00 : f32
    %26 = vector.broadcast %cst_13 : f32 to vector<1x128x196xf32>
    %27 = arith.maximumf %25, %26 : vector<1x128x196xf32>
    %c0_14 = arith.constant 0 : index
    %c0_15 = arith.constant 0 : index
    %c0_16 = arith.constant 0 : index
    %28 = vector.load %arg4[%c0_14, %c0_15, %c0_16] : memref<1x128x196xf32, #tpu.memory_space<vmem>>, vector<1x128x196xf32>
    tpu.vector_store %arg4[%c0_14, %c0_15, %c0_16], %27 {strides = array<i32>} : memref<1x128x196xf32, #tpu.memory_space<vmem>>, vector<1x128x196xf32>,
    return
  }
  func.func @transform_0(%arg0: i32) -> (i32, i32, i32) {
    %c0_i32 = arith.constant 0 : i32
    %c0_i32_0 = arith.constant 0 : i32
    %c0_i32_1 = arith.constant 0 : i32
    return %c0_i32, %arg0, %c0_i32_0 : i32, i32, i32
  }
  func.func @transform_1(%arg0: i32) -> (i32, i32, i32) {
    %c0_i32 = arith.constant 0 : i32
    %c0_i32_0 = arith.constant 0 : i32
    %c0_i32_1 = arith.constant 0 : i32
    return %c0_i32, %arg0, %c0_i32_0 : i32, i32, i32
  }
  func.func @transform_2(%arg0: i32) -> (i32, i32, i32) {
    %c0_i32 = arith.constant 0 : i32
    %c0_i32_0 = arith.constant 0 : i32
    %c0_i32_1 = arith.constant 0 : i32
    return %c0_i32, %arg0, %c0_i32_0 : i32, i32, i32
  }
  func.func @transform_3(%arg0: i32) -> (i32, i32, i32) {
    %c0_i32 = arith.constant 0 : i32
    %c0_i32_0 = arith.constant 0 : i32
    %c0_i32_1 = arith.constant 0 : i32
    return %c0_i32, %arg0, %c0_i32_0 : i32, i32, i32
  }
}

</mosaic_0001>

<bundles_post_ra>
// kernel: tpu_custom_call.1
= control target key start
LH: loop header
LB: loop body
LE: loop exit
PB: predicated region body
PF: predicated region fallthrough
CT: control target
= control target key end

     0   :  { %s1077_s12 = smov 0   ;;  %s1618_s0 = inlined_call_operand.vmem [shape: f32[1,512,196], index: 0, kind: input, shape index: {}]   ;;  %s1619_s1 = inlined_call_operand.vmem [shape: f32[1,512,1], index: 1, kind: input, shape index: {}]   ;;  %s1620_s2 = inlined_call_operand.vmem [shape: f32[1,512,1], index: 2, kind: input, shape index: {}]   ;;  %s1621_s3 = inlined_call_operand.vmem [shape: f32[1,512,196], index: 3, kind: output, shape index: {}]  }
   0x1 LB: > { %s979_s13 = sadd.s32 4294967295, %s1054_s12   ;;  %p983_p0 = scmp.ge.s32.totalorder %s1054_s12, 1  ;;  %s1054_s12 = sphi %s1077_s12, %s13_s12  }
   0x2   : > { %p161_p1 = scmp.lt.s32.totalorder %s1054_s12, 5 }
   0x4   : > { %p162_p2 = pnand %p983_p0, %p161_p1 }
   0x6   : > { %165 = sbr.rel (%p162_p2) target bundleno = 424 (0x1a8), region = 32 }
   0xd   : > { %s984_s14 = sshll.u32 %s979_s13, 4  ;;  %vm255_vm0 = vcmask 556032  }
   0xe   : > { %p198_p3 = scmp.lt.s32.totalorder %s984_s14, 63 }
  0x10   : > { %s1635_s14 = smov (!%p198_p3, %s984_s14), 63 }
  0x11   : > { %s996_s15 = sshll.u32 %s1635_s14, 4  ;;  %s988_s19 = sshll.u32 %s1635_s14, 3 }
  0x12   : > { %s1093_s18 = scalar_lea.vmem %s1618_s0, %s996_s15  ;;  %s1369_s22 = scalar_lea.vmem %s1619_s1, %s988_s19 }
  0x13   : > { %v1096_v0 = vld [vmem:[%s1093_s18 + $0x20] sm:$0xff]  ;;  %v1099_v1 = vld [vmem:[%s1093_s18 + $0x28] sm:$0xff]  ;;  %v1110_v5 = vld [vmem:[%s1093_s18 + $0x30] sm:$0xff]  ;;  %s1448_s25 = scalar_lea.vmem %s1620_s2, %s988_s19  ;;  %s1513_s28 = scalar_lea.vmem %s1621_s3, %s996_s15 }
  0x14   : > { %v1102_v2 = vld [vmem:[%s1093_s18] sm:$0xff]  ;;  %v264_v3 = vsel %vm255_vm0, %v1099_v1, 0.0  ;;  %v1107_v4 = vld [vmem:[%s1093_s18 + $0x8] sm:$0xff]  ;;  %v1113_v6 = vld [vmem:[%s1093_s18 + $0x38] sm:$0xff] }
  0x15   : > { %v265_v7 = vadd.f32 %v264_v3, %v1096_v0  ;;  %v256_v8 = vsel %vm255_vm0, %v1107_v4, 0.0  ;;  %v268_v9 = vsel %vm255_vm0, %v1113_v6, 0.0  ;;  %v1121_v10 = vld [vmem:[%s1093_s18 + $0x10] sm:$0xff]  ;;  %v1124_v11 = vld [vmem:[%s1093_s18 + $0x18] sm:$0xff]  ;;  %v1133_v15 = vld [vmem:[%s1093_s18 + $0x48] sm:$0xff]  ;;  %v321_v63 = vmul.f32 %v1107_v4, %v1107_v4 }
  0x16   : > { %v257_v12 = vadd.f32 %v256_v8, %v1102_v2  ;;  %v260_v13 = vsel %vm255_vm0, %v1124_v11, 0.0  ;;  %v1130_v14 = vld [vmem:[%s1093_s18 + $0x58] sm:$0xff]  ;;  %v269_v16 = vadd.f32 %v268_v9, %v1110_v5  ;;  %v1138_v18 = vld [vmem:[%s1093_s18 + $0x50] sm:$0xff]  ;;  %v1143_v20 = vld [vmem:[%s1093_s18 + $0x40] sm:$0xff]  ;;  %v272_v21 = vsel %vm255_vm0, %v1133_v15, 0.0 }
  0x17   : > { %266 = vadd.xlane.f32.xlu1 %v265_v7  ;;  %v261_v17 = vadd.f32 %v260_v13, %v1121_v10  ;;  %v276_v19 = vsel %vm255_vm0, %v1130_v14, 0.0  ;;  %v1148_v22 = vld [vmem:[%s1093_s18 + $0x78] sm:$0xff]  ;;  %v1151_v23 = vld [vmem:[%s1093_s18 + $0x68] sm:$0xff]  ;;  %v273_v25 = vadd.f32 %v272_v21, %v1143_v20  ;;  %v1156_v26 = vld [vmem:[%s1093_s18 + $0x70] sm:$0xff]  ;;  %v323_v60 = vmul.f32 %v1124_v11, %v1124_v11 }
  0x18   : > { %258 = vadd.xlane.f32.xlu0 %v257_v12  ;;  %1626 = vst [vmem:[#allocation2_spill] sm:$0xff] %v1151_v23  ;;  %v277_v24 = vadd.f32 %v276_v19, %v1138_v18  ;;  %v284_v27 = vsel %vm255_vm0, %v1148_v22, 0.0  ;;  %v1161_v28 = vld [vmem:[%s1093_s18 + $0x60] sm:$0xff]  ;;  %v280_v29 = vsel %vm255_vm0, %v1151_v23, 0.0  ;;  %v1166_v30 = vld [vmem:[%s1093_s18 + $0x98] sm:$0xff]  ;;  %v1169_v31 = vld [vmem:[%s1093_s18 + $0x88] sm:$0xff]  ;;  %v322_v7 = vmul.f32 %v1121_v10, %v1121_v10 }
  0x19   : > { %v285_v32 = vadd.f32 %v284_v27, %v1156_v26  ;;  %v281_v33 = vadd.f32 %v280_v29, %v1161_v28  ;;  %v1174_v34 = vld [vmem:[%s1093_s18 + $0x90] sm:$0xff]  ;;  %v292_v35 = vsel %vm255_vm0, %v1166_v30, 0.0  ;;  %v1179_v36 = vld [vmem:[%s1093_s18 + $0x80] sm:$0xff]  ;;  %v288_v37 = vsel %vm255_vm0, %v1169_v31, 0.0  ;;  %v1184_v38 = vld [vmem:[%s1093_s18 + $0xb8] sm:$0xff] }
  0x1a   : > { %1627 = vst [vmem:[#allocation3_spill] sm:$0xff] %v1179_v36  ;;  %v1187_v39 = vld [vmem:[%s1093_s18 + $0xa8] sm:$0xff]  ;;  %v293_v40 = vadd.f32 %v292_v35, %v1174_v34  ;;  %v289_v41 = vadd.f32 %v288_v37, %v1179_v36  ;;  %v1192_v42 = vld [vmem:[%s1093_s18 + $0xb0] sm:$0xff]  ;;  %v300_v43 = vsel %vm255_vm0, %v1184_v38, 0.0  ;;  %v1197_v44 = vld [vmem:[%s1093_s18 + $0xa0] sm:$0xff]  ;;  %v356_v9 = vsel %vm255_vm0, %v323_v60, 0.0 }
  0x1b   : > { %270 = vadd.xlane.f32.xlu1 %v269_v16  ;;  %v296_v45 = vsel %vm255_vm0, %v1187_v39, 0.0  ;;  %v1202_v46 = vld [vmem:[%s1093_s18 + $0xd8] sm:$0xff]  ;;  %v1205_v47 = vld [vmem:[%s1093_s18 + $0xc8] sm:$0xff]  ;;  %v301_v48 = vadd.f32 %v300_v43, %v1192_v42  ;;  %v1210_v50 = vld [vmem:[%s1093_s18 + $0xd0] sm:$0xff]  ;;  %v320_v12 = vmul.f32 %v1102_v2, %v1102_v2  ;;  %v327_v13 = vmul.f32 %v1113_v6, %v1113_v6 }
  0x1c   : > { %262 = vadd.xlane.f32.xlu0 %v261_v17  ;;  %v297_v49 = vadd.f32 %v296_v45, %v1197_v44  ;;  %v308_v51 = vsel %vm255_vm0, %v1202_v46, 0.0  ;;  %v1215_v52 = vld [vmem:[%s1093_s18 + $0xc0] sm:$0xff]  ;;  %v304_v53 = vsel %vm255_vm0, %v1205_v47, 0.0  ;;  %v1220_v54 = vld [vmem:[%s1093_s18 + $0xf8] sm:$0xff]  ;;  %v1223_v55 = vld [vmem:[%s1093_s18 + $0xe8] sm:$0xff]  ;;  %v352_v16 = vsel %vm255_vm0, %v321_v63, 0.0 }
  0x1d   : > { %1628 = vst [vmem:[#allocation4_spill] sm:$0xff] %v1220_v54  ;;  %v309_v56 = vadd.f32 %v308_v51, %v1210_v50  ;;  %v305_v57 = vadd.f32 %v304_v53, %v1215_v52  ;;  %v1228_v58 = vld [vmem:[%s1093_s18 + $0xf0] sm:$0xff]  ;;  %v316_v59 = vsel %vm255_vm0, %v1220_v54, 0.0  ;;  %v1235_v61 = vld [vmem:[%s1093_s18 + $0xe0] sm:$0xff]  ;;  %v312_v62 = vsel %vm255_vm0, %v1223_v55, 0.0 }
  0x1e   : > { %1629 = vst [vmem:[#allocation5_spill] sm:$0xff] %v1228_v58  ;;  %v317_v3 = vadd.f32 %v316_v59, %v1228_v58  ;;  %v313_v8 = vadd.f32 %v312_v62, %v1235_v61  ;;  %v325_v17 = vmul.f32 %v1099_v1, %v1099_v1  ;;  %v357_v19 = vadd.f32 %v356_v9, %v322_v7 }
  0x1f   : > { %278 = vadd.xlane.f32.xlu1 %v277_v24  ;;  %v326_v21 = vmul.f32 %v1110_v5, %v1110_v5  ;;  %v353_v24 = vadd.f32 %v352_v16, %v320_v12  ;;  %v324_v27 = vmul.f32 %v1096_v0, %v1096_v0  ;;  %v331_v29 = vmul.f32 %v1130_v14, %v1130_v14 }
  0x20   : > { %274 = vadd.xlane.f32.xlu0 %v273_v25  ;;  %v364_v25 = vsel %vm255_vm0, %v327_v13, 0.0  ;;  %v330_v37 = vmul.f32 %v1138_v18, %v1138_v18  ;;  %v328_v43 = vmul.f32 %v1143_v20, %v1143_v20  ;;  %v335_v45 = vmul.f32 %v1148_v22, %v1148_v22 }
  0x21   : > { %v365_v35 = vadd.f32 %v364_v25, %v326_v21  ;;  %v334_v53 = vmul.f32 %v1156_v26, %v1156_v26  ;;  %v332_v59 = vmul.f32 %v1161_v28, %v1161_v28  ;;  %v339_v60 = vmul.f32 %v1166_v30, %v1166_v30 }
  0x22   : > { %v337_v63 = vmul.f32 %v1169_v31, %v1169_v31  ;;  %v338_v7 = vmul.f32 %v1174_v34, %v1174_v34  ;;  %v336_v12 = vmul.f32 %v1179_v36, %v1179_v36  ;;  %v343_v13 = vmul.f32 %v1184_v38, %v1184_v38 }
  0x23   : > { %286 = vadd.xlane.f32.xlu1 %v285_v32  ;;  %v360_v32 = vsel %vm255_vm0, %v325_v17, 0.0  ;;  %v388_v9 = vsel %vm255_vm0, %v339_v60, 0.0  ;;  %v341_v31 = vmul.f32 %v1187_v39, %v1187_v39  ;;  %v340_v25 = vmul.f32 %v1197_v44, %v1197_v44 }
  0x24   : > { %282 = vadd.xlane.f32.xlu0 %v281_v33  ;;  %v329_v33 = vmul.f32 %v1133_v15, %v1133_v15  ;;  %v384_v16 = vsel %vm255_vm0, %v337_v63, 0.0  ;;  %v389_v17 = vadd.f32 %v388_v9, %v338_v7  ;;  %v345_v39 = vmul.f32 %v1205_v47, %v1205_v47 }
  0x25   : > { %v385_v21 = vadd.f32 %v384_v16, %v336_v12  ;;  %v344_v44 = vmul.f32 %v1215_v52, %v1215_v52  ;;  %v349_v47 = vmul.f32 %v1223_v55, %v1223_v55  ;;  %v348_v52 = vmul.f32 %v1235_v61, %v1235_v61 }
  0x26   : > { %v1056_v55 = vmov 0  }
  0x27   : > { %294 = vadd.xlane.f32.xlu1 %v293_v40  ;;  %v361_v40 = vadd.f32 %v360_v32, %v324_v27  ;;  %v347_v27 = vmul.f32 %v1202_v46, %v1202_v46  ;;  %1007 = vset.pattern.permute.xlu0 %v1056_v55 }
  0x28   : > { %290 = vadd.xlane.f32.xlu0 %v289_v41  ;;  %v372_v41 = vsel %vm255_vm0, %v331_v29, 0.0  ;;  %v392_v29 = vsel %vm255_vm0, %v341_v31, 0.0  ;;  %1008 = vset.pattern.permute.xlu1 %v1056_v55 }
  0x29   : > { %v373_v51 = vadd.f32 %v372_v41, %v330_v37  ;;  %v404_v37 = vsel %vm255_vm0, %v347_v27, 0.0  ;;  %v400_v41 = vsel %vm255_vm0, %v345_v39, 0.0 }
  0x2b   : > { %302 = vadd.xlane.f32.xlu1 %v301_v48  ;;  %v368_v48 = vsel %vm255_vm0, %v329_v33, 0.0  ;;  %v346_v33 = vmul.f32 %v1210_v50, %v1210_v50 }
  0x2c   : > { %298 = vadd.xlane.f32.xlu0 %v297_v49  ;;  %v333_v49 = vmul.f32 %v1151_v23, %v1151_v23 }
  0x2e   : > { %v376_v62 = vsel %vm255_vm0, %v333_v49, 0.0 }
  0x2f   : > { %310 = vadd.xlane.f32.xlu1 %v309_v56  ;;  %v369_v56 = vadd.f32 %v368_v48, %v328_v43  ;;  %v405_v43 = vadd.f32 %v404_v37, %v346_v33  ;;  %v401_v48 = vadd.f32 %v400_v41, %v344_v44 }
  0x30   : > { %306 = vadd.xlane.f32.xlu0 %v305_v57  ;;  %v380_v57 = vsel %vm255_vm0, %v335_v45, 0.0  ;;  %v350_v45 = vmul.f32 %v1228_v58, %v1228_v58 }
  0x33   : > { %318 = vadd.xlane.f32.xlu1 %v317_v3  ;;  %v381_v3 = vadd.f32 %v380_v57, %v334_v53 }
  0x34   : > { %314 = vadd.xlane.f32.xlu0 %v313_v8  ;;  %v377_v8 = vadd.f32 %v376_v62, %v332_v59 }
  0x37   : > { %358 = vadd.xlane.f32.xlu1 %v357_v19  ;;  %v342_v19 = vmul.f32 %v1192_v42, %v1192_v42 }
  0x38   : > { %354 = vadd.xlane.f32.xlu0 %v353_v24  ;;  %v396_v24 = vsel %vm255_vm0, %v343_v13, 0.0 }
  0x39   : > { %v397_v32 = vadd.f32 %v396_v24, %v342_v19 }
  0x3b   : > { %366 = vadd.xlane.f32.xlu1 %v365_v35  ;;  %v393_v35 = vadd.f32 %v392_v29, %v340_v25 }
  0x3c   : > { %362 = vadd.xlane.f32.xlu0 %v361_v40  ;;  %v351_v40 = vmul.f32 %v1220_v54, %v1220_v54 }
  0x3e   : > { %v412_v49 = vsel %vm255_vm0, %v351_v40, 0.0 }
  0x3f   : > { %374 = vadd.xlane.f32.xlu1 %v373_v51  ;;  %v408_v51 = vsel %vm255_vm0, %v349_v47, 0.0  ;;  %v413_v53 = vadd.f32 %v412_v49, %v350_v45 }
  0x40   : > { %370 = vadd.xlane.f32.xlu0 %v369_v56  ;;  %v409_v56 = vadd.f32 %v408_v51, %v348_v52 }
  0x43   : > { %382 = vadd.xlane.f32.xlu1 %v381_v3 }
  0x44   : > { %378 = vadd.xlane.f32.xlu0 %v377_v8 }
  0x47   : > { %390 = vadd.xlane.f32.xlu1 %v389_v17 }
  0x48   : > { %386 = vadd.xlane.f32.xlu0 %v385_v21 }
  0x4b   : > { %398 = vadd.xlane.f32.xlu1 %v397_v32 }
  0x4c   : > { %394 = vadd.xlane.f32.xlu0 %v393_v35 }
  0x4f   : > { %406 = vadd.xlane.f32.xlu1 %v405_v43 }
  0x50   : > { %402 = vadd.xlane.f32.xlu0 %v401_v48 }
  0x53   : > { %414 = vadd.xlane.f32.xlu1 %v413_v53 }
  0x54   : > { %410 = vadd.xlane.f32.xlu0 %v409_v56 }
  0xa4   : > { %v267_v57 = vpop.xlane.xlu1 %266 }
  0xa5   : > { %v259_v59 = vpop.xlane.xlu0 %258  ;;  %v1339_v33 = vmul.f32 0.0051020407, %v267_v57 }
  0xa6   : > { %v1333_v24 = vmul.f32 0.0051020407, %v259_v59 }
  0xa7   : > { %v451_v51 = vmul.f32 %v1339_v33, %v1339_v33 }
  0xa8   : > { %v271_v60 = vpop.xlane.xlu1 %270  ;;  %v449_v35 = vmul.f32 %v1333_v24, %v1333_v24 }
  0xa9   : > { %v263_v62 = vpop.xlane.xlu0 %262  ;;  %v1335_v27 = vmul.f32 0.0051020407, %v271_v60 }
  0xaa   : > { %v1329_v19 = vmul.f32 0.0051020407, %v263_v62 }
  0xab   : > { %v452_v43 = vmul.f32 %v1335_v27, %v1335_v27 }
  0xac   : > { %v279_v63 = vpop.xlane.xlu1 %278  ;;  %v450_v29 = vmul.f32 %v1329_v19, %v1329_v19 }
  0xad   : > { %v275_v3 = vpop.xlane.xlu0 %274  ;;  %v1343_v40 = vmul.f32 0.0051020407, %v279_v63 }
  0xae   : > { %v1347_v45 = vmul.f32 0.0051020407, %v275_v3 }
  0xaf   : > { %v454_v59 = vmul.f32 %v1343_v40, %v1343_v40 }
  0xb0   : > { %v287_v7 = vpop.xlane.xlu1 %286  ;;  %v453_v3 = vmul.f32 %v1347_v45, %v1347_v45 }
  0xb1   : > { %v283_v8 = vpop.xlane.xlu0 %282 }
  0xb4   : > { %v295_v61 = vpop.xlane.xlu1 %294 }
  0xb5   : > { %v291_v9 = vpop.xlane.xlu0 %290 }
  0xb8   : > { %v1319_v12 = vpop.xlane.xlu1 %302 }
  0xb9   : > { %v1321_v13 = vpop.xlane.xlu0 %298 }
  0xbc   : > { %v1323_v16 = vpop.xlane.xlu1 %310 }
  0xbd   : > { %v1325_v31 = vpop.xlane.xlu0 %306 }
  0xc0   : > { %v1327_v17 = vpop.xlane.xlu1 %318 }
  0xc1   : > { %v1331_v21 = vpop.xlane.xlu0 %314 }
  0xc4   : > { %v359_v25 = vpop.xlane.xlu1 %358 }
  0xc5   : > { %v434_v39 = vmul.f32 0.0051020407, %v359_v25  ;;  %v355_v32 = vpop.xlane.xlu0 %354 }
  0xc6   : > { %v433_v37 = vmul.f32 0.0051020407, %v355_v32  ;;  %v1355_v32 = vmul.f32 0.0051020407, %v283_v8 }
  0xc7   : > { %v466_v44 = vsub.f32 %v434_v39, %v450_v29 }
  0xc8   : > { %v465_v41 = vsub.f32 %v433_v37, %v449_v35  ;;  %v367_v47 = vpop.xlane.xlu1 %366 }
  0xc9   : > { %v482_v48 = vmax.f32 %v466_v44, 0.0  ;;  %v436_v49 = vmul.f32 0.0051020407, %v367_v47  ;;  %v363_v52 = vpop.xlane.xlu0 %362 }
  0xca   : > { %v481_v53 = vmax.f32 %v465_v41, 0.0  ;;  %v435_v56 = vmul.f32 0.0051020407, %v363_v52  ;;  %v1360_v52 = vmul.f32 0.0051020407, %v295_v61 }
  0xcb   : > { %v514_v55 = vadd.f32 1e-05, %v482_v48  ;;  %v468_v57 = vsub.f32 %v436_v49, %v452_v43  ;;  %v1358_v49 = vmul.f32 0.0051020407, %v287_v7 }
  0xcc   : > { %v513_v60 = vadd.f32 1e-05, %v481_v53  ;;  %v467_v62 = vsub.f32 %v435_v56, %v451_v51  ;;  %v375_v63 = vpop.xlane.xlu1 %374  ;;  %v455_v53 = vmul.f32 %v1355_v32, %v1355_v32 }
  0xcd   : > { %1009 = vrsqrt.f32 %v514_v55  ;;  %v484_v25 = vmax.f32 %v468_v57, 0.0  ;;  %v438_v29 = vmul.f32 0.0051020407, %v375_v63  ;;  %v371_v39 = vpop.xlane.xlu0 %370  ;;  %v1371_v55 = vmul.f32 0.0051020407, %v291_v9 }
  0xce   : > { %1011 = vrsqrt.f32 %v513_v60  ;;  %v483_v35 = vmax.f32 %v467_v62, 0.0  ;;  %v437_v37 = vmul.f32 0.0051020407, %v371_v39  ;;  %v458_v62 = vmul.f32 %v1360_v52, %v1360_v52 }
  0xcf   : > { %v470_v44 = vsub.f32 %v438_v29, %v454_v59  ;;  %v516_v41 = vadd.f32 1e-05, %v484_v25  ;;  %v1376_v63 = vmul.f32 0.0051020407, %v1319_v12  ;;  %v498_v29 = vld [vmem:[%s1369_s22 + $0x8] sm:$0xff]  ;;  %v456_v39 = vmul.f32 %v1358_v49, %v1358_v49 }
  0xd0   : > { %v515_v47 = vadd.f32 1e-05, %v483_v35  ;;  %v469_v43 = vsub.f32 %v437_v37, %v453_v3  ;;  %v383_v48 = vpop.xlane.xlu1 %382  ;;  %v1382_v9 = vmul.f32 0.0051020407, %v1323_v16  ;;  %v497_v35 = vld [vmem:[%s1369_s22] sm:$0xff] }
  0xd1   : > { %v379_v51 = vpop.xlane.xlu0 %378  ;;  %v486_v7 = vmax.f32 %v470_v44, 0.0  ;;  %v440_v57 = vmul.f32 0.0051020407, %v383_v48  ;;  %v457_v44 = vmul.f32 %v1371_v55, %v1371_v55  ;;  %v460_v16 = vmul.f32 %v1376_v63, %v1376_v63 }
  0xd2   : > { %1013 = vrsqrt.f32 %v515_v47  ;;  %v485_v8 = vmax.f32 %v469_v43, 0.0  ;;  %v439_v56 = vmul.f32 0.0051020407, %v379_v51 }
  0xd3   : > { %1015 = vrsqrt.f32 %v516_v41  ;;  %v518_v41 = vadd.f32 1e-05, %v486_v7  ;;  %v472_v48 = vsub.f32 %v440_v57, %v456_v39  ;;  %v1394_v7 = vmul.f32 0.0051020407, %v1321_v13 }
  0xd4   : > { %v517_v61 = vadd.f32 1e-05, %v485_v8  ;;  %v471_v59 = vsub.f32 %v439_v56, %v455_v53  ;;  %v391_v60 = vpop.xlane.xlu1 %390  ;;  %v1401_v57 = vmul.f32 0.0051020407, %v1327_v17 }
  0xd5   : > { %v442_v3 = vmul.f32 0.0051020407, %v391_v60  ;;  %v387_v25 = vpop.xlane.xlu0 %386  ;;  %v488_v39 = vmax.f32 %v472_v48, 0.0 }
  0xd6   : > { %v441_v43 = vmul.f32 0.0051020407, %v387_v25  ;;  %1017 = vrsqrt.f32 %v517_v61  ;;  %v487_v51 = vmax.f32 %v471_v59, 0.0  ;;  %v499_v61 = vld [vmem:[%s1369_s22 + $0x10] sm:$0xff] }
  0xd7   : > { %v1010_v37 = vpop.eup %1009  ;;  %v474_v47 = vsub.f32 %v442_v3, %v458_v62  ;;  %v462_v62 = vmul.f32 %v1382_v9, %v1382_v9  ;;  %1019 = vrsqrt.f32 %v518_v41  ;;  %v464_v41 = vmul.f32 %v1401_v57, %v1401_v57 }
  0xd8   : > { %v1012_v12 = vpop.eup %1011  ;;  %v399_v53 = vpop.xlane.xlu1 %398  ;;  %v1387_v8 = vmul.f32 %v1010_v37, %v498_v29  ;;  %v473_v3 = vsub.f32 %v441_v43, %v457_v44  ;;  %v519_v13 = vadd.f32 1e-05, %v487_v51  ;;  %v459_v44 = vmul.f32 %v1394_v7, %v1394_v7 }
  0xd9   : > { %v490_v56 = vmax.f32 %v474_v47, 0.0  ;;  %v444_v60 = vmul.f32 0.0051020407, %v399_v53  ;;  %v395_v36 = vpop.xlane.xlu0 %394  ;;  %v1391_v54 = vmul.f32 %v1012_v12, %v497_v35  ;;  %v1409_v43 = vmul.f32 0.0051020407, %v1325_v31 }
  0xda   : > { %616 = vperm.xlu1 %1008, %v1387_v8   ;;  %v443_v35 = vmul.f32 0.0051020407, %v395_v36  ;;  %v489_v48 = vmax.f32 %v473_v3, 0.0 }
  0xdb   : > { %v522_v59 = vadd.f32 1e-05, %v490_v56  ;;  %v476_v25 = vsub.f32 %v444_v60, %v460_v16  ;;  %611 = vperm.xlu0 %1007, %v1391_v54   ;;  %v500_v16 = vld [vmem:[%s1369_s22 + $0x18] sm:$0xff]  ;;  %v520_v56 = vadd.f32 1e-05, %v488_v39  ;;  %v461_v3 = vmul.f32 %v1409_v43, %v1409_v43  ;;  %v501_v39 = vld [vmem:[%s1369_s22 + $0x20] sm:$0xff] }
  0xdc   : > { %v1014_v29 = vpop.eup %1013  ;;  %v407_v37 = vpop.xlane.xlu1 %406  ;;  %v475_v60 = vsub.f32 %v443_v35, %v459_v44 }
  0xdd   : > { %1021 = vrsqrt.f32 %v522_v59  ;;  %v492_v47 = vmax.f32 %v476_v25, 0.0  ;;  %v446_v12 = vmul.f32 0.0051020407, %v407_v37  ;;  %v403_v53 = vpop.xlane.xlu0 %402  ;;  %v1404_v58 = vmul.f32 %v1014_v29, %v499_v61  ;;  %v1016_v17 = vpop.eup %1015 }
  0xde   : > { %1023 = vrsqrt.f32 %v519_v13  ;;  %v445_v61 = vmul.f32 0.0051020407, %v403_v53  ;;  %v1415_v37 = vmul.f32 %v1016_v17, %v500_v16  ;;  %v521_v13 = vadd.f32 1e-05, %v489_v48  ;;  %v502_v48 = vld [vmem:[%s1369_s22 + $0x28] sm:$0xff] }
  0xdf   : > { %v524_v36 = vadd.f32 1e-05, %v492_v47  ;;  %v478_v51 = vsub.f32 %v446_v12, %v462_v62  ;;  %621 = vperm.xlu1 %1008, %v1404_v58   ;;  %v1420_v62 = vmul.f32 0.0051020407, %v1331_v21  ;;  %v491_v12 = vmax.f32 %v475_v60, 0.0 }
  0xe0   : > { %v415_v59 = vpop.xlane.xlu1 %414  ;;  %v1018_v23 = vpop.eup %1017  ;;  %v477_v53 = vsub.f32 %v445_v61, %v461_v3  ;;  %v503_v3 = vld [vmem:[%s1369_s22 + $0x30] sm:$0xff] }
  0xe1   : > { %1025 = vrsqrt.f32 %v524_v36  ;;  %v494_v25 = vmax.f32 %v478_v51, 0.0  ;;  %v448_v29 = vmul.f32 0.0051020407, %v415_v59  ;;  %v411_v31 = vpop.xlane.xlu0 %410  ;;  %v1424_v16 = vmul.f32 %v1018_v23, %v501_v39  ;;  %v506_v36 = vld [vmem:[%s1369_s22 + $0x48] sm:$0xff]  ;;  %v1020_v51 = vpop.eup %1019 }
  0xe2   : > { %1027 = vrsqrt.f32 %v520_v56  ;;  %v447_v17 = vmul.f32 0.0051020407, %v411_v31  ;;  %v463_v21 = vmul.f32 %v1420_v62, %v1420_v62  ;;  %v523_v56 = vadd.f32 1e-05, %v491_v12 }
  0xe3   : > { %v526_v35 = vadd.f32 1e-05, %v494_v25  ;;  %v480_v47 = vsub.f32 %v448_v29, %v464_v41  ;;  %626 = vperm.xlu1 %1008, %v1415_v37   ;;  %v493_v60 = vmax.f32 %v477_v53, 0.0  ;;  %v550_v23 = vmul.f32 %v1020_v51, %v502_v48  ;;  %v508_v29 = vld [vmem:[%s1369_s22 + $0x58] sm:$0xff]  ;;  %v510_v53 = vld [vmem:[%s1369_s22 + $0x68] sm:$0xff] }
  0xe4   : > { %v479_v61 = vsub.f32 %v447_v17, %v463_v21 }
  0xe5   : > { %1029 = vrsqrt.f32 %v526_v35  ;;  %v496_v44 = vmax.f32 %v480_v47, 0.0 }
  0xe6   : > { %1031 = vrsqrt.f32 %v521_v13  ;;  %v525_v13 = vadd.f32 1e-05, %v493_v60  ;;  %v495_v35 = vmax.f32 %v479_v61, 0.0 }
  0xe7   : > { %v1022_v59 = vpop.eup %1021  ;;  %v528_v41 = vadd.f32 1e-05, %v496_v44  ;;  %631 = vperm.xlu1 %1008, %v1424_v16   ;;  %v504_v44 = vld [vmem:[%s1369_s22 + $0x38] sm:$0xff] }
  0xe8   : > { %v1431_v25 = vmul.f32 %v1022_v59, %v506_v36  ;;  %v1024_v31 = vpop.eup %1023  ;;  %v527_v51 = vadd.f32 1e-05, %v495_v35 }
  0xe9   : > { %1033 = vrsqrt.f32 %v528_v41  ;;  %v1436_v12 = vmul.f32 %v1024_v31, %v503_v3  ;;  %v512_v41 = vld [vmem:[%s1369_s22 + $0x78] sm:$0xff]  ;;  %v562_v3 = vld [vmem:[%s1448_s25 + $0x8] sm:$0xff] }
  0xea   : > { %656 = vperm.xlu0 %1007, %v1431_v25   ;;  %1035 = vrsqrt.f32 %v523_v56  ;;  %v505_v56 = vld [vmem:[%s1369_s22 + $0x40] sm:$0xff] }
  0xeb   : > { %v1026_v39 = vpop.eup %1025  ;;  %636 = vperm.xlu1 %1008, %v550_v23   ;;  %1037 = vrsqrt.f32 %v525_v13  ;;  %v507_v13 = vld [vmem:[%s1369_s22 + $0x50] sm:$0xff] }
  0xec   : > { %v556_v47 = vmul.f32 %v1026_v39, %v508_v29  ;;  %v1028_v17 = vpop.eup %1027  ;;  %1039 = vrsqrt.f32 %v527_v51  ;;  %v578_v29 = vmul.f32 %v1387_v8, %v1329_v19  ;;  %v509_v51 = vld [vmem:[%s1369_s22 + $0x60] sm:$0xff]  ;;  %v582_v8 = vmul.f32 %v550_v23, %v1343_v40 }
  0xed   : > { %v552_v59 = vmul.f32 %v1028_v17, %v504_v44  ;;  %v564_v44 = vld [vmem:[%s1448_s25 + $0x18] sm:$0xff]  ;;  %v586_v23 = vmul.f32 %v1431_v25, %v1360_v52  ;;  %v565_v52 = vld [vmem:[%s1448_s25 + $0x20] sm:$0xff] }
  0xee   : > { %666 = vperm.xlu0 %1007, %v556_v47   ;;  %v594_v35 = vsub.f32 %v562_v3, %v578_v29  ;;  %v568_v3 = vld [vmem:[%s1448_s25 + $0x38] sm:$0xff] }
  0xef   : > { %v1030_v36 = vpop.eup %1029  ;;  %641 = vperm.xlu1 %1008, %v1436_v12  }
  0xf0   : > { %v558_v21 = vmul.f32 %v1030_v36, %v510_v53  ;;  %v1032_v48 = vpop.eup %1031  ;;  %v580_v53 = vmul.f32 %v1415_v37, %v1335_v27  ;;  %v584_v37 = vmul.f32 %v552_v59, %v1358_v49  ;;  %v579_v49 = vmul.f32 %v1404_v58, %v1339_v33 }
  0xf1   : > { %v553_v31 = vmul.f32 %v1032_v48, %v505_v56 }
  0xf2   : > { %676 = vperm.xlu0 %1007, %v558_v21   ;;  %v596_v19 = vsub.f32 %v564_v44, %v580_v53  ;;  %v600_v40 = vsub.f32 %v568_v3, %v584_v37  ;;  %v570_v53 = vld [vmem:[%s1448_s25 + $0x48] sm:$0xff]  ;;  %v590_v58 = vmul.f32 %v558_v21, %v1382_v9  ;;  %v569_v9 = vld [vmem:[%s1448_s25 + $0x40] sm:$0xff] }
  0xf3   : > { %v1034_v60 = vpop.eup %1033  ;;  %646 = vperm.xlu1 %1008, %v552_v59   ;;  %v563_v59 = vld [vmem:[%s1448_s25 + $0x10] sm:$0xff]  ;;  %v602_v44 = vsub.f32 %v570_v53, %v586_v23  ;;  %v573_v3 = vld [vmem:[%s1448_s25 + $0x60] sm:$0xff] }
  0xf4   : > { %v560_v61 = vmul.f32 %v1034_v60, %v512_v41  ;;  %v1036_v39 = vpop.eup %1035  ;;  %v566_v41 = vld [vmem:[%s1448_s25 + $0x28] sm:$0xff]  ;;  %v511_v60 = vld [vmem:[%s1369_s22 + $0x70] sm:$0xff] }
  0xf5   : > { %v555_v17 = vmul.f32 %v1036_v39, %v507_v13  ;;  %v1038_v36 = vpop.eup %1037  ;;  %v598_v27 = vsub.f32 %v566_v41, %v582_v8  ;;  %v577_v39 = vmul.f32 %v1391_v54, %v1333_v24  ;;  %v561_v13 = vld [vmem:[%s1448_s25] sm:$0xff]  ;;  %v588_v54 = vmul.f32 %v556_v47, %v1376_v63  ;;  %v567_v63 = vld [vmem:[%s1448_s25 + $0x30] sm:$0xff]  ;;  %v576_v41 = vld [vmem:[%s1448_s25 + $0x78] sm:$0xff] }
  0xf6   : > { %686 = vperm.xlu0 %1007, %v560_v61   ;;  %v557_v48 = vmul.f32 %v1038_v36, %v509_v51  ;;  %v1040_v56 = vpop.eup %1039  ;;  %v595_v24 = vsub.f32 %v563_v59, %v579_v49  ;;  %v572_v36 = vld [vmem:[%s1448_s25 + $0x58] sm:$0xff]  ;;  %v581_v51 = vmul.f32 %v1424_v16, %v1347_v45  ;;  %v583_v8 = vmul.f32 %v1436_v12, %v1355_v32  ;;  %v571_v12 = vld [vmem:[%s1448_s25 + $0x50] sm:$0xff] }
  0xf7   : > { %651 = vperm.xlu1 %1008, %v553_v31   ;;  %v559_v29 = vmul.f32 %v1040_v56, %v511_v60  ;;  %v604_v25 = vsub.f32 %v572_v36, %v588_v54  ;;  %v592_v45 = vmul.f32 %v560_v61, %v1401_v57  ;;  %v585_v56 = vmul.f32 %v553_v31, %v1371_v55  ;;  %v575_v55 = vld [vmem:[%s1448_s25 + $0x70] sm:$0xff] }
  0xf8   : > { %v597_v33 = vsub.f32 %v565_v52, %v581_v51  ;;  %v599_v16 = vsub.f32 %v567_v63, %v583_v8  ;;  %v587_v32 = vmul.f32 %v555_v17, %v1394_v7  ;;  %v589_v37 = vmul.f32 %v557_v48, %v1409_v43 }
  0xf9   : > { %v608_v21 = vsub.f32 %v576_v41, %v592_v45  ;;  %v601_v60 = vsub.f32 %v569_v9, %v585_v56  ;;  %v591_v61 = vmul.f32 %v559_v29, %v1420_v62 }
  0xfa   : > { %728 = vperm.xlu0 %1007, %v594_v35   ;;  %v593_v35 = vsub.f32 %v561_v13, %v577_v39  ;;  %v605_v57 = vsub.f32 %v573_v3, %v589_v37 }
  0xfb   : > { %661 = vperm.xlu1 %1008, %v555_v17   ;;  %v607_v31 = vsub.f32 %v575_v55, %v591_v61 }
  0xfe   : > { %738 = vperm.xlu0 %1007, %v596_v19   ;;  %v574_v19 = vld [vmem:[%s1448_s25 + $0x68] sm:$0xff] }
  0xff   : > { %671 = vperm.xlu1 %1008, %v557_v48   ;;  %v606_v47 = vsub.f32 %v574_v19, %v590_v58 }
 0x102   : > { %748 = vperm.xlu0 %1007, %v598_v27   ;;  %v603_v27 = vsub.f32 %v571_v12, %v587_v32 }
 0x103   : > { %681 = vperm.xlu1 %1008, %v559_v29  }
 0x106   : > { %758 = vperm.xlu0 %1007, %v600_v40  }
 0x107   : > { %723 = vperm.xlu1 %1008, %v593_v35  }
 0x10a   : > { %768 = vperm.xlu0 %1007, %v602_v44  }
 0x10b   : > { %733 = vperm.xlu1 %1008, %v595_v24  }
 0x10e   : > { %778 = vperm.xlu0 %1007, %v604_v25  }
 0x10f   : > { %743 = vperm.xlu1 %1008, %v597_v33  }
 0x112   : > { %788 = vperm.xlu0 %1007, %v606_v47  }
 0x113   : > { %753 = vperm.xlu1 %1008, %v599_v16  }
 0x116   : > { %798 = vperm.xlu0 %1007, %v608_v21  }
 0x117   : > { %763 = vperm.xlu1 %1008, %v601_v60  }
 0x11b   : > { %773 = vperm.xlu1 %1008, %v603_v27  }
 0x11f   : > { %783 = vperm.xlu1 %1008, %v605_v57  }
 0x123   : > { %793 = vperm.xlu1 %1008, %v607_v31  }
 0x159   : > { %v617_v39 = vpop.permute.xlu1 %616 }
 0x15a   : > { %v612_v23 = vpop.permute.xlu0 %611  ;;  %v691_v59 = vmul.f32 %v617_v39, %v1121_v10  ;;  %v692_v44 = vmul.f32 %v617_v39, %v1124_v11 }
 0x15b   : > { %v690_v32 = vmul.f32 %v612_v23, %v1107_v4 }
 0x15e   : > { %v622_v13 = vpop.permute.xlu1 %621 }
 0x15f   : > { %v693_v4 = vmul.f32 %v622_v13, %v1096_v0  ;;  %v694_v31 = vmul.f32 %v622_v13, %v1099_v1 }
 0x162   : > { %v627_v40 = vpop.permute.xlu1 %626 }
 0x163   : > { %v695_v52 = vmul.f32 %v627_v40, %v1110_v5  ;;  %v696_v10 = vmul.f32 %v627_v40, %v1113_v6 }
 0x166   : > { %v1492_v7 = vpop.permute.xlu1 %631 }
 0x169   : > { %v657_v17 = vpop.permute.xlu0 %656 }
 0x16a   : > { %v637_v35 = vpop.permute.xlu1 %636  ;;  %v708_v61 = vmul.f32 %v657_v17, %v1166_v30 }
 0x16b   : > { %v699_v63 = vmul.f32 %v637_v35, %v1138_v18  ;;  %v700_v47 = vmul.f32 %v637_v35, %v1130_v14  ;;  %v689_v14 = vmul.f32 %v612_v23, %v1102_v2 }
 0x16d   : > { %v1494_v53 = vpop.permute.xlu0 %666 }
 0x16e   : > { %v1496_v43 = vpop.permute.xlu1 %641  ;;  %v711_v0 = vmul.f32 %v1494_v53, %v1192_v42  ;;  %v712_v1 = vmul.f32 %v1494_v53, %v1184_v38 }
 0x171   : > { %v1498_v48 = vpop.permute.xlu0 %676 }
 0x172   : > { %v647_v62 = vpop.permute.xlu1 %646 }
 0x173   : > { %v703_v9 = vmul.f32 %v647_v62, %v1156_v26  ;;  %v704_v21 = vmul.f32 %v647_v62, %v1148_v22  ;;  %v707_v22 = vmul.f32 %v657_v17, %v1174_v34 }
 0x175   : > { %v1500_v29 = vpop.permute.xlu0 %686 }
 0x176   : > { %v1502_v49 = vpop.permute.xlu1 %651 }
 0x179   : > { %v729_v54 = vpop.permute.xlu0 %728 }
 0x17a   : > { %v1506_v24 = vpop.permute.xlu1 %661  ;;  %v803_v36 = vadd.f32 %v729_v54, %v691_v59  ;;  %v804_v51 = vadd.f32 %v729_v54, %v692_v44  ;;  %v697_v44 = vmul.f32 %v1492_v7, %v1143_v20  ;;  %v698_v54 = vmul.f32 %v1492_v7, %v1133_v15 }
 0x17b   : > { %v715_v15 = vmul.f32 %v1498_v48, %v1210_v50  ;;  %v716_v7 = vmul.f32 %v1498_v48, %v1202_v46  ;;  %v1631_v48 = vld [vmem:[#allocation5_spill] sm:$0xff] }
 0x17c   : > { %v835_v11 = vmax.f32 %v803_v36, 0.0  ;;  %v836_v25 = vmax.f32 %v804_v51, 0.0 }
 0x17d   : > { %v739_v58 = vpop.permute.xlu0 %738 }
 0x17e   : > { %867 = vst [vmem:[%s1513_s28 + $0x10] sm:$0xff] %v835_v11  ;;  %868 = vst.msk [vmem:[%s1513_s28 + $0x18] sm:$0xff] %vm255_vm0, %v836_v25  ;;  %v1520_v33 = vpop.permute.xlu1 %671  ;;  %v807_v19 = vadd.f32 %v739_v58, %v695_v52  ;;  %v808_v8 = vadd.f32 %v739_v58, %v696_v10  ;;  %v701_v58 = vmul.f32 %v1496_v43, %v1161_v28 }
 0x180   : > { %v839_v45 = vmax.f32 %v807_v19, 0.0  ;;  %v840_v5 = vmax.f32 %v808_v8, 0.0  ;;  %v1630_v19 = vld [vmem:[#allocation2_spill] sm:$0xff] }
 0x181   : > { %v749_v16 = vpop.permute.xlu0 %748  ;;  %v702_v8 = vmul.f32 %v1496_v43, %v1630_v19  ;;  %v719_v43 = vmul.f32 %v1500_v29, %v1631_v48 }
 0x182   : > { %871 = vst [vmem:[%s1513_s28 + $0x30] sm:$0xff] %v839_v45  ;;  %872 = vst.msk [vmem:[%s1513_s28 + $0x38] sm:$0xff] %vm255_vm0, %v840_v5  ;;  %v1527_v6 = vpop.permute.xlu1 %681  ;;  %v811_v41 = vadd.f32 %v749_v16, %v699_v63  ;;  %v812_v56 = vadd.f32 %v749_v16, %v700_v47 }
 0x184   : > { %v843_v60 = vmax.f32 %v811_v41, 0.0  ;;  %v844_v18 = vmax.f32 %v812_v56, 0.0  ;;  %v1632_v41 = vld [vmem:[#allocation4_spill] sm:$0xff] }
 0x185   : > { %v759_v12 = vpop.permute.xlu0 %758  ;;  %v720_v56 = vmul.f32 %v1500_v29, %v1632_v41 }
 0x186   : > { %875 = vst [vmem:[%s1513_s28 + $0x50] sm:$0xff] %v843_v60  ;;  %876 = vst.msk [vmem:[%s1513_s28 + $0x58] sm:$0xff] %vm255_vm0, %v844_v18  ;;  %v724_v27 = vpop.permute.xlu1 %723  ;;  %v815_v37 = vadd.f32 %v759_v12, %v703_v9  ;;  %v816_v3 = vadd.f32 %v759_v12, %v704_v21  ;;  %v1633_v60 = vld [vmem:[#allocation3_spill] sm:$0xff] }
 0x187   : > { %v801_v57 = vadd.f32 %v724_v27, %v689_v14  ;;  %v802_v26 = vadd.f32 %v724_v27, %v690_v32  ;;  %v705_v18 = vmul.f32 %v1502_v49, %v1633_v60  ;;  %v1041_v14 = vld [vmem:[%s1093_s18 + $0x88] sm:$0xff] }
 0x188   : > { %v847_v2 = vmax.f32 %v815_v37, 0.0  ;;  %v848_v55 = vmax.f32 %v816_v3, 0.0  ;;  %v706_v32 = vmul.f32 %v1041_v14, %v1502_v49 }
 0x189   : > { %v833_v39 = vmax.f32 %v801_v57, 0.0  ;;  %v834_v40 = vmax.f32 %v802_v26, 0.0  ;;  %v769_v23 = vpop.permute.xlu0 %768 }
 0x18a   : > { %879 = vst [vmem:[%s1513_s28 + $0x70] sm:$0xff] %v847_v2  ;;  %880 = vst.msk [vmem:[%s1513_s28 + $0x78] sm:$0xff] %vm255_vm0, %v848_v55  ;;  %v734_v35 = vpop.permute.xlu1 %733  ;;  %v819_v62 = vadd.f32 %v769_v23, %v707_v22  ;;  %v820_v59 = vadd.f32 %v769_v23, %v708_v61  ;;  %v1042_v2 = vld [vmem:[%s1093_s18 + $0xa0] sm:$0xff] }
 0x18b   : > { %865 = vst [vmem:[%s1513_s28] sm:$0xff] %v833_v39  ;;  %866 = vst.msk [vmem:[%s1513_s28 + $0x8] sm:$0xff] %vm255_vm0, %v834_v40  ;;  %v805_v30 = vadd.f32 %v734_v35, %v693_v4  ;;  %v806_v34 = vadd.f32 %v734_v35, %v694_v31  ;;  %v709_v55 = vmul.f32 %v1042_v2, %v1506_v24  ;;  %v1043_v4 = vld [vmem:[%s1093_s18 + $0xa8] sm:$0xff] }
 0x18c   : > { %v851_v13 = vmax.f32 %v819_v62, 0.0  ;;  %v852_v17 = vmax.f32 %v820_v59, 0.0  ;;  %v710_v31 = vmul.f32 %v1043_v4, %v1506_v24  ;;  %v1044_v59 = vld [vmem:[%s1093_s18 + $0xc0] sm:$0xff] }
 0x18d   : > { %v837_v36 = vmax.f32 %v805_v30, 0.0  ;;  %v838_v51 = vmax.f32 %v806_v34, 0.0  ;;  %v779_v52 = vpop.permute.xlu0 %778  ;;  %v713_v30 = vmul.f32 %v1044_v59, %v1520_v33  ;;  %v1045_v34 = vld [vmem:[%s1093_s18 + $0xc8] sm:$0xff] }
 0x18e   : > { %883 = vst [vmem:[%s1513_s28 + $0x90] sm:$0xff] %v851_v13  ;;  %884 = vst.msk [vmem:[%s1513_s28 + $0x98] sm:$0xff] %vm255_vm0, %v852_v17  ;;  %v744_v10 = vpop.permute.xlu1 %743  ;;  %v823_v42 = vadd.f32 %v779_v52, %v711_v0  ;;  %v824_v11 = vadd.f32 %v779_v52, %v712_v1  ;;  %v714_v24 = vmul.f32 %v1045_v34, %v1520_v33 }
 0x18f   : > { %869 = vst [vmem:[%s1513_s28 + $0x20] sm:$0xff] %v837_v36  ;;  %870 = vst.msk [vmem:[%s1513_s28 + $0x28] sm:$0xff] %vm255_vm0, %v838_v51  ;;  %v809_v38 = vadd.f32 %v744_v10, %v697_v44  ;;  %v810_v20 = vadd.f32 %v744_v10, %v698_v54  ;;  %v1046_v54 = vld [vmem:[%s1093_s18 + $0xe0] sm:$0xff]  ;;  %v1047_v51 = vld [vmem:[%s1093_s18 + $0xe8] sm:$0xff] }
 0x190   : > { %v855_v53 = vmax.f32 %v823_v42, 0.0  ;;  %v856_v25 = vmax.f32 %v824_v11, 0.0  ;;  %v717_v36 = vmul.f32 %v1046_v54, %v1527_v6  ;;  %v718_v52 = vmul.f32 %v1047_v51, %v1527_v6 }
 0x191   : > { %v841_v63 = vmax.f32 %v809_v38, 0.0  ;;  %v842_v47 = vmax.f32 %v810_v20, 0.0  ;;  %v789_v45 = vpop.permute.xlu0 %788 }
 0x192   : > { %887 = vst [vmem:[%s1513_s28 + $0xb0] sm:$0xff] %v855_v53  ;;  %888 = vst.msk [vmem:[%s1513_s28 + $0xb8] sm:$0xff] %vm255_vm0, %v856_v25  ;;  %v754_v5 = vpop.permute.xlu1 %753  ;;  %v827_v50 = vadd.f32 %v789_v45, %v715_v15  ;;  %v828_v16 = vadd.f32 %v789_v45, %v716_v7 }
 0x193   : > { %873 = vst [vmem:[%s1513_s28 + $0x40] sm:$0xff] %v841_v63  ;;  %874 = vst.msk [vmem:[%s1513_s28 + $0x48] sm:$0xff] %vm255_vm0, %v842_v47  ;;  %v813_v46 = vadd.f32 %v754_v5, %v701_v58  ;;  %v814_v28 = vadd.f32 %v754_v5, %v702_v8 }
 0x194   : > { %v859_v9 = vmax.f32 %v827_v50, 0.0  ;;  %v860_v21 = vmax.f32 %v828_v16, 0.0 }
 0x195   : > { %v845_v12 = vmax.f32 %v813_v46, 0.0  ;;  %v846_v27 = vmax.f32 %v814_v28, 0.0  ;;  %v799_v37 = vpop.permute.xlu0 %798 }
 0x196   : > { %891 = vst [vmem:[%s1513_s28 + $0xd0] sm:$0xff] %v859_v9  ;;  %892 = vst.msk [vmem:[%s1513_s28 + $0xd8] sm:$0xff] %vm255_vm0, %v860_v21  ;;  %v764_v3 = vpop.permute.xlu1 %763  ;;  %v831_v29 = vadd.f32 %v799_v37, %v719_v43  ;;  %v832_v57 = vadd.f32 %v799_v37, %v720_v56 }
 0x197   : > { %877 = vst [vmem:[%s1513_s28 + $0x60] sm:$0xff] %v845_v12  ;;  %878 = vst.msk [vmem:[%s1513_s28 + $0x68] sm:$0xff] %vm255_vm0, %v846_v27  ;;  %v817_v26 = vadd.f32 %v764_v3, %v705_v18  ;;  %v818_v22 = vadd.f32 %v764_v3, %v706_v32 }
 0x198   : > { %v863_v49 = vmax.f32 %v831_v29, 0.0  ;;  %v864_v61 = vmax.f32 %v832_v57, 0.0 }
 0x199   : > { %v849_v39 = vmax.f32 %v817_v26, 0.0  ;;  %v850_v40 = vmax.f32 %v818_v22, 0.0 }
 0x19a   : > { %895 = vst [vmem:[%s1513_s28 + $0xf0] sm:$0xff] %v863_v49  ;;  %896 = vst.msk [vmem:[%s1513_s28 + $0xf8] sm:$0xff] %vm255_vm0, %v864_v61  ;;  %v774_v23 = vpop.permute.xlu1 %773 }
 0x19b   : > { %881 = vst [vmem:[%s1513_s28 + $0x80] sm:$0xff] %v849_v39  ;;  %882 = vst.msk [vmem:[%s1513_s28 + $0x88] sm:$0xff] %vm255_vm0, %v850_v40  ;;  %v821_v35 = vadd.f32 %v774_v23, %v709_v55  ;;  %v822_v62 = vadd.f32 %v774_v23, %v710_v31 }
 0x19d   : > { %v853_v0 = vmax.f32 %v821_v35, 0.0  ;;  %v854_v1 = vmax.f32 %v822_v62, 0.0 }
 0x19e   : > { %v784_v13 = vpop.permute.xlu1 %783 }
 0x19f   : > { %885 = vst [vmem:[%s1513_s28 + $0xa0] sm:$0xff] %v853_v0  ;;  %886 = vst.msk [vmem:[%s1513_s28 + $0xa8] sm:$0xff] %vm255_vm0, %v854_v1  ;;  %v825_v17 = vadd.f32 %v784_v13, %v713_v30  ;;  %v826_v44 = vadd.f32 %v784_v13, %v714_v24 }
 0x1a1   : > { %v857_v10 = vmax.f32 %v825_v17, 0.0  ;;  %v858_v42 = vmax.f32 %v826_v44, 0.0 }
 0x1a2   : > { %v794_v33 = vpop.permute.xlu1 %793 }
 0x1a3   : > { %889 = vst [vmem:[%s1513_s28 + $0xc0] sm:$0xff] %v857_v10  ;;  %890 = vst.msk [vmem:[%s1513_s28 + $0xc8] sm:$0xff] %vm255_vm0, %v858_v42  ;;  %v829_v11 = vadd.f32 %v794_v33, %v717_v36  ;;  %v830_v38 = vadd.f32 %v794_v33, %v718_v52 }
 0x1a5   : > { %v861_v20 = vmax.f32 %v829_v11, 0.0  ;;  %v862_v15 = vmax.f32 %v830_v38, 0.0 }
 0x1a7   : > { %893 = vst [vmem:[%s1513_s28 + $0xe0] sm:$0xff] %v861_v20  ;;  %894 = vst.msk [vmem:[%s1513_s28 + $0xe8] sm:$0xff] %vm255_vm0, %v862_v15 }
 0x1a8 PF: > { %s13_s12 = sadd.s32 1, %s1054_s12  }
 0x1a9   : > { %p10_p4 = scmp.ge.s32.totalorder %s13_s12, 6  }
 0x1ab   :  { %12 = sbr.rel (!%p10_p4) target bundleno = 1 (0x1), region = 68 }

</bundles_post_ra>
